<compile_context>
chip_gen: v5e
topology: v5e:2x2
jax: 0.10.0
libtpu: 0.0.40
codegen_flags: <defaults>
</compile_context>

<pallas_src>
import functools

import jax
import jax.numpy as jnp
import numpy as np
from jax import lax
from jax.experimental import pallas as pl
from jax.experimental.pallas import tpu as pltpu


def _round_up(x, m):
    return ((x + m - 1) // m) * m


def _sigmoid_eup(x):
    # sigmoid(x) == 0.5*tanh(0.5*x) + 0.5 : single EUP push per gate (no exp + divide).
    return 0.5 * jnp.tanh(0.5 * x) + 0.5


# ---------------------------------------------------------------------------
# Pallas kernel: merged bidirectional GRU recurrence over one time chunk
# ---------------------------------------------------------------------------
def _bigru_kernel(gi_ref, lens_ref, whh_ref, bhhn_ref, out_ref, *,
                  hidden, t_chunk, unroll):
    # gi_ref:   (T_c, B_p, 3P) bf16  precomputed input projections, gate slabs [r | z | n],
    #                                each slab = [fwd(H) | bwd(H) | pad], bwd pre-reversed in t.
    # lens_ref: (B_p, 1)       i32   valid sequence lengths (0 for padded batch rows).
    # whh_ref:  (P, 3P)        bf16  block-diagonal recurrent weights (fwd ++ bwd).
    # bhhn_ref: (1, P)         f32   recurrent bias of the n gate (added before r*gh_n).
    # out_ref:  (B_p, P)       f32   hidden state carry / final [h_fwd | h_bwd | pad].
    chunk = pl.program_id(0)
    t_total = pl.num_programs(0) * t_chunk
    B, P = out_ref.shape

    @pl.when(chunk == 0)
    def _():
        out_ref[...] = jnp.zeros_like(out_ref)

    # Hoisted per-chunk: weights resident in vregs, broadcasts done once.
    whh = whh_ref[...]                                          # (P, 3P) bf16
    bhh_n = jnp.broadcast_to(bhhn_ref[...], (B, P))             # (B, P)  f32
    lens_b = jnp.broadcast_to(lens_ref[...], (B, P))            # (B, P)  i32
    lane = lax.broadcasted_iota(jnp.int32, (B, P), 1)
    is_fwd = lane < hidden                                      # fwd lanes [0, H)
    t0 = chunk * t_chunk

    def body(s, h):
        t = t0 + s                                              # global timestep
        gi = gi_ref[s].astype(jnp.float32)                      # (B, 3P)
        # One merged fwd+bwd recurrent matmul, bf16 operands, f32 accumulate (MXU native).
        gh = jnp.dot(h.astype(jnp.bfloat16), whh,
                     preferred_element_type=jnp.float32)        # (B, 3P)
        # PyTorch GRU gate order [r, z, n]; slabs are 128-lane aligned (offsets 0, P, 2P).
        r = _sigmoid_eup(gi[:, 0:P] + gh[:, 0:P])
        z = _sigmoid_eup(gi[:, P:2 * P] + gh[:, P:2 * P])
        n = jnp.tanh(gi[:, 2 * P:3 * P] + r * (gh[:, 2 * P:3 * P] + bhh_n))
        h_new = (1.0 - z) * n + z * h
        # Packed-sequence mask, computed in-kernel (no mask tensor streamed from HBM):
        #   fwd lanes: update while t < len; bwd lanes (time pre-reversed): t_total-1-t < len.
        t_eff = jnp.where(is_fwd, t, t_total - 1 - t)           # (B, P) i32
        m = t_eff < lens_b
        return jnp.where(m, h_new, h)                           # single select

    out_ref[...] = lax.fori_loop(0, t_chunk, body, out_ref[...], unroll=unroll)


# ---------------------------------------------------------------------------
# Wrapper
# ---------------------------------------------------------------------------
def query_encoder_forward(emb_matrix, params, inputs, lengths, hidden_size,
                          t_chunk=16, unroll=4):
    """inputs: (B, T) int32 token ids; lengths: (B,) int32 valid lengths."""
    B, T = inputs.shape
    H = hidden_size
    H2 = 2 * H
    E = emb_matrix.shape[1]
    P = _round_up(H2, 128)                  # gate-slab / state width, 128-lane aligned
    B_p = _round_up(B, 8)                   # sublane-aligned batch
    T_c = max(1, min(t_chunk, T))           # timesteps per grid chunk
    T_pad = _round_up(T, T_c)
    n_chunks = T_pad // T_c

    # --- Glue: embedding gather, time-major, padded once (time + batch) ---
    x = jnp.take(emb_matrix, inputs, axis=0).astype(jnp.float32)          # (B, T, E)
    x = jnp.transpose(x, (1, 0, 2))                                       # (T, B, E)
    x = jnp.pad(x, ((0, T_pad - T), (0, B_p - B), (0, 0)))                # (T_pad, B_p, E)
    x_cat = jnp.concatenate([x, x[::-1]], axis=-1)                        # fwd | bwd(reversed)

    # --- Packed input projection: ONE einsum directly into the kernel layout ---
    # W_packed: rows [0:E] = fwd weights, rows [E:2E] = bwd weights; per gate slab g the
    # columns [gP, gP+H) are fwd, [gP+H, gP+2H) are bwd, rest structural zero (pad lanes).
    w2 = jnp.zeros((2 * E, 3 * P), jnp.float32)
    bias = jnp.zeros((1, 1, 3 * P), jnp.float32)
    for g in range(3):
        w2 = w2.at[0:E, g * P:g * P + H].set(params["wih_f"][:, g * H:(g + 1) * H])
        w2 = w2.at[E:2 * E, g * P + H:g * P + H2].set(params["wih_b"][:, g * H:(g + 1) * H])
        bias = bias.at[0, 0, g * P:g * P + H].set(params["bih_f"][0, g * H:(g + 1) * H])
        bias = bias.at[0, 0, g * P + H:g * P + H2].set(params["bih_b"][0, g * H:(g + 1) * H])
    for g in range(2):  # fold recurrent r/z biases; b_hn must stay inside r*(gh_n + b_hn)
        bias = bias.at[0, 0, g * P:g * P + H].add(params["bhh_f"][0, g * H:(g + 1) * H])
        bias = bias.at[0, 0, g * P + H:g * P + H2].add(params["bhh_b"][0, g * H:(g + 1) * H])

    gi_all = (jnp.einsum("tbe,eg->tbg", x_cat, w2) + bias).astype(jnp.bfloat16)  # (T_pad,B_p,3P)

    # --- Block-diagonal recurrent weights (fwd ++ bwd), gate slabs padded to P lanes, bf16 ---
    whh = jnp.zeros((P, 3 * P), jnp.float32)
    for g in range(3):
        whh = whh.at[0:H, g * P:g * P + H].set(params["whh_f"][:, g * H:(g + 1) * H])
        whh = whh.at[H:H2, g * P + H:g * P + H2].set(params["whh_b"][:, g * H:(g + 1) * H])
    whh = whh.astype(jnp.bfloat16)

    bhh_n = jnp.zeros((1, P), jnp.float32)
    bhh_n = bhh_n.at[:, 0:H].set(params["bhh_f"][:, 2 * H:3 * H])
    bhh_n = bhh_n.at[:, H:H2].set(params["bhh_b"][:, 2 * H:3 * H])

    lens2d = jnp.zeros((B_p, 1), jnp.int32).at[:B, 0].set(lengths.astype(jnp.int32))

    kernel = functools.partial(_bigru_kernel, hidden=H, t_chunk=T_c,
                               unroll=max(1, min(unroll, T_c)))

    # VMEM budget: 2 double-buffered gi chunks + weights + state + headroom.
    gi_chunk_bytes = T_c * B_p * 3 * P * 2
    whh_bytes = P * 3 * P * 2
    vmem_budget = int(min(max(2 * gi_chunk_bytes + 2 * whh_bytes + 4 * B_p * P * 4 + (2 << 20),
                              4 << 20), 64 << 20))

    out = pl.pallas_call(
        kernel,
        out_shape=jax.ShapeDtypeStruct((B_p, P), jnp.float32),
        grid_spec=pltpu.PrefetchScalarGridSpec(
            num_scalar_prefetch=0,
            grid=(n_chunks,),
            in_specs=[
                pl.BlockSpec((T_c, B_p, 3 * P), lambda t: (t, 0, 0)),   # gi chunk (streamed)
                pl.BlockSpec((B_p, 1), lambda t: (0, 0)),               # lengths (resident)
                pl.BlockSpec((P, 3 * P), lambda t: (0, 0)),             # W_hh (resident)
                pl.BlockSpec((1, P), lambda t: (0, 0)),                 # b_hn (resident)
            ],
            out_specs=pl.BlockSpec((B_p, P), lambda t: (0, 0)),         # h carry / final
        ),
        compiler_params=pltpu.CompilerParams(
            dimension_semantics=("arbitrary",),          # serial recurrence over time chunks
            vmem_limit_bytes=vmem_budget,
        ),
    )(gi_all, lens2d, whh, bhh_n)

    return out[:B, 0:H2]


# ---------------------------------------------------------------------------
# Pure-JAX f32 reference (mirrors torch pack_padded_sequence + bidirectional GRU)
# ---------------------------------------------------------------------------
def query_encoder_reference(emb_matrix, params, inputs, lengths, hidden_size):
    H = hidden_size
    B, T = inputs.shape
    x = jnp.take(emb_matrix, inputs, axis=0).astype(jnp.float32)  # (B, T, E)

    def step(x_t, h, wih, whh, bih, bhh):
        gi = x_t @ wih + bih
        gh = h @ whh + bhh
        r = jax.nn.sigmoid(gi[:, 0:H] + gh[:, 0:H])
        z = jax.nn.sigmoid(gi[:, H:2 * H] + gh[:, H:2 * H])
        n = jnp.tanh(gi[:, 2 * H:3 * H] + r * gh[:, 2 * H:3 * H])
        return (1.0 - z) * n + z * h

    def run(reverse, wih, whh, bih, bhh):
        h = jnp.zeros((B, H), jnp.float32)
        ts = range(T - 1, -1, -1) if reverse else range(T)
        for t in ts:
            h_new = step(x[:, t], h, wih, whh, bih, bhh)
            mask = (t < lengths)[:, None]
            h = jnp.where(mask, h_new, h)
        return h

    hf = run(False, params["wih_f"], params["whh_f"], params["bih_f"], params["bhh_f"])
    hb = run(True, params["wih_b"], params["whh_b"], params["bih_b"], params["bhh_b"])
    return jnp.concatenate([hf, hb], axis=-1)


# ---------------------------------------------------------------------------
# Main
# ---------------------------------------------------------------------------
if __name__ == "__main__":
    B, T = 2, 8            # batch, sequence length
    V, E = 20, 32          # vocab size, embedding dim (emb_matrix shape)
    H = 32                 # hidden_size

    key = jax.random.PRNGKey(0)
    k_emb, k_tok, kf1, kf2, kf3, kf4, kb1, kb2, kb3, kb4 = jax.random.split(key, 10)

    s = 1.0 / np.sqrt(H)
    emb_matrix = jax.random.normal(k_emb, (V, E), jnp.float32)
    params = {
        "wih_f": jax.random.uniform(kf1, (E, 3 * H), jnp.float32, -s, s),
        "whh_f": jax.random.uniform(kf2, (H, 3 * H), jnp.float32, -s, s),
        "bih_f": jax.random.uniform(kf3, (1, 3 * H), jnp.float32, -s, s),
        "bhh_f": jax.random.uniform(kf4, (1, 3 * H), jnp.float32, -s, s),
        "wih_b": jax.random.uniform(kb1, (E, 3 * H), jnp.float32, -s, s),
        "whh_b": jax.random.uniform(kb2, (H, 3 * H), jnp.float32, -s, s),
        "bih_b": jax.random.uniform(kb3, (1, 3 * H), jnp.float32, -s, s),
        "bhh_b": jax.random.uniform(kb4, (1, 3 * H), jnp.float32, -s, s),
    }

    inputs = jax.random.randint(k_tok, (B, T), 0, V, dtype=jnp.int32)
    lengths = jnp.array([T, 5], dtype=jnp.int32)  # variable-length (packed) sequences

    # t_chunk=4 -> grid=(2,) so the chunked time pipeline + carried state are exercised.
    out = query_encoder_forward(emb_matrix, params, inputs, lengths, H, t_chunk=4, unroll=4)
    out = jax.block_until_ready(out)

    ref = query_encoder_reference(emb_matrix, params, inputs, lengths, H)
    # bf16 gi + bf16 recurrent matmul (f32 accumulate / gate math) -> slightly loose tolerance.
    np.testing.assert_allclose(np.asarray(out), np.asarray(ref), rtol=3e-2, atol=3e-2)

    assert out.shape == (B, 2 * H)
    print("KERNEL_OK")
</pallas_src>

<mosaic_0001>
module attributes {stable_mosaic.version = 11 : i64} {
  func.func @_bigru_kernel(%arg0: i32, %arg1: memref<4x8x384xbf16, #tpu.memory_space<vmem>>, %arg2: memref<8x1xi32, #tpu.memory_space<vmem>>, %arg3: memref<128x384xbf16, #tpu.memory_space<vmem>>, %arg4: memref<1x128xf32, #tpu.memory_space<vmem>>, %arg5: memref<8x128xf32, #tpu.memory_space<vmem>>) attributes {dimension_semantics = [#tpu.dimension_semantics<arbitrary>], iteration_bounds = array<i64: 2>, scalar_prefetch = 0 : i64, scratch_operands = 0 : i64, tpu.core_type = #tpu.core_type<tc>, window_params = [{transform_indices = @transform_0, window_bounds = array<i64: 4, 8, 384>}, {pipeline_mode = #tpu.pipeline_mode<synchronous>, transform_indices = @transform_1, window_bounds = array<i64: 8, 1>}, {pipeline_mode = #tpu.pipeline_mode<synchronous>, transform_indices = @transform_2, window_bounds = array<i64: 128, 384>}, {pipeline_mode = #tpu.pipeline_mode<synchronous>, transform_indices = @transform_3, window_bounds = array<i64: 1, 128>}, {pipeline_mode = #tpu.pipeline_mode<synchronous>, transform_indices = @transform_4, window_bounds = array<i64: 8, 128>}]} {
    %c0_i32 = arith.constant 0 : i32
    %0 = arith.cmpi eq, %arg0, %c0_i32 : i32
    %1 = arith.extui %0 : i1 to i32
    %c0_i32_0 = arith.constant 0 : i32
    %2 = arith.cmpi ne, %1, %c0_i32_0 : i32
    scf.if %2 {
      %cst_54 = arith.constant 0.000000e+00 : f32
      %192 = vector.broadcast %cst_54 : f32 to vector<8x128xf32>
      %c0_55 = arith.constant 0 : index
      %c0_56 = arith.constant 0 : index
      %193 = vector.load %arg5[%c0_55, %c0_56] : memref<8x128xf32, #tpu.memory_space<vmem>>, vector<8x128xf32>
      tpu.vector_store %arg5[%c0_55, %c0_56], %192 {strides = array<i32>} : memref<8x128xf32, #tpu.memory_space<vmem>>, vector<8x128xf32>,
    } else {
    }
    %c0 = arith.constant 0 : index
    %c0_1 = arith.constant 0 : index
    %3 = vector.load %arg3[%c0, %c0_1] : memref<128x384xbf16, #tpu.memory_space<vmem>>, vector<128x384xbf16>
    %c0_2 = arith.constant 0 : index
    %c0_3 = arith.constant 0 : index
    %4 = vector.load %arg4[%c0_2, %c0_3] : memref<1x128xf32, #tpu.memory_space<vmem>>, vector<1x128xf32>
    %5 = vector.shape_cast %4 : vector<1x128xf32> to vector<1x128xf32>
    %6 = vector.broadcast %5 : vector<1x128xf32> to vector<8x128xf32>
    %c0_4 = arith.constant 0 : index
    %c0_5 = arith.constant 0 : index
    %7 = vector.load %arg2[%c0_4, %c0_5] : memref<8x1xi32, #tpu.memory_space<vmem>>, vector<8x1xi32>
    %8 = vector.shape_cast %7 : vector<8x1xi32> to vector<8x1xi32>
    %9 = vector.broadcast %8 : vector<8x1xi32> to vector<8x128xi32>
    %10 = tpu.iota {dimensions = array<i32: 1>} : vector<8x128xi32>
    %c32_i32 = arith.constant 32 : i32
    %11 = vector.broadcast %c32_i32 : i32 to vector<8x128xi32>
    %12 = arith.cmpi slt, %10, %11 : vector<8x128xi32>
    %c4_i32 = arith.constant 4 : i32
    %13 = arith.muli %arg0, %c4_i32 : i32
    %c0_6 = arith.constant 0 : index
    %c0_7 = arith.constant 0 : index
    %14 = vector.load %arg5[%c0_6, %c0_7] : memref<8x128xf32, #tpu.memory_space<vmem>>, vector<8x128xf32>
    %c0_i32_8 = arith.constant 0 : i32
    %15 = arith.addi %13, %c0_i32_8 : i32
    %16 = arith.index_cast %c0_i32_8 : i32 to index
    %c0_9 = arith.constant 0 : index
    %c0_10 = arith.constant 0 : index
    %17 = vector.load %arg1[%16, %c0_9, %c0_10] : memref<4x8x384xbf16, #tpu.memory_space<vmem>>, vector<1x8x384xbf16>
    %18 = vector.shape_cast %17 : vector<1x8x384xbf16> to vector<8x384xbf16>
    %19 = arith.extf %18 : vector<8x384xbf16> to vector<8x384xf32>
    %20 = arith.truncf %14 : vector<8x128xf32> to vector<8x128xbf16>
    %cst = arith.constant dense<0.000000e+00> : vector<8x384xf32>
    %21 = tpu.matmul %20, %3, %cst {dimension_numbers = #tpu.dot_dimension_numbers<[1], [0], [0], [1], [0, 0, 1, 1], [], []>} : vector<8x128xbf16>, vector<128x384xbf16>, vector<8x384xf32> -> vector<8x384xf32>
    %22 = vector.extract_strided_slice %19 {offsets = [0, 0], sizes = [8, 128], strides = [1, 1]} : vector<8x384xf32> to vector<8x128xf32>
    %23 = vector.extract_strided_slice %21 {offsets = [0, 0], sizes = [8, 128], strides = [1, 1]} : vector<8x384xf32> to vector<8x128xf32>
    %24 = arith.addf %22, %23 : vector<8x128xf32>
    %cst_11 = arith.constant 5.000000e-01 : f32
    %25 = vector.broadcast %cst_11 : f32 to vector<8x128xf32>
    %26 = arith.mulf %25, %24 : vector<8x128xf32>
    %27 = math.tanh %26 : vector<8x128xf32>
    %cst_12 = arith.constant 5.000000e-01 : f32
    %28 = vector.broadcast %cst_12 : f32 to vector<8x128xf32>
    %29 = arith.mulf %28, %27 : vector<8x128xf32>
    %cst_13 = arith.constant 5.000000e-01 : f32
    %30 = vector.broadcast %cst_13 : f32 to vector<8x128xf32>
    %31 = arith.addf %29, %30 : vector<8x128xf32>
    %32 = vector.extract_strided_slice %19 {offsets = [0, 128], sizes = [8, 128], strides = [1, 1]} : vector<8x384xf32> to vector<8x128xf32>
    %33 = vector.extract_strided_slice %21 {offsets = [0, 128], sizes = [8, 128], strides = [1, 1]} : vector<8x384xf32> to vector<8x128xf32>
    %34 = arith.addf %32, %33 : vector<8x128xf32>
    %cst_14 = arith.constant 5.000000e-01 : f32
    %35 = vector.broadcast %cst_14 : f32 to vector<8x128xf32>
    %36 = arith.mulf %35, %34 : vector<8x128xf32>
    %37 = math.tanh %36 : vector<8x128xf32>
    %cst_15 = arith.constant 5.000000e-01 : f32
    %38 = vector.broadcast %cst_15 : f32 to vector<8x128xf32>
    %39 = arith.mulf %38, %37 : vector<8x128xf32>
    %cst_16 = arith.constant 5.000000e-01 : f32
    %40 = vector.broadcast %cst_16 : f32 to vector<8x128xf32>
    %41 = arith.addf %39, %40 : vector<8x128xf32>
    %42 = vector.extract_strided_slice %19 {offsets = [0, 256], sizes = [8, 128], strides = [1, 1]} : vector<8x384xf32> to vector<8x128xf32>
    %43 = vector.extract_strided_slice %21 {offsets = [0, 256], sizes = [8, 128], strides = [1, 1]} : vector<8x384xf32> to vector<8x128xf32>
    %44 = arith.addf %43, %6 : vector<8x128xf32>
    %45 = arith.mulf %31, %44 : vector<8x128xf32>
    %46 = arith.addf %42, %45 : vector<8x128xf32>
    %47 = math.tanh %46 : vector<8x128xf32>
    %cst_17 = arith.constant 1.000000e+00 : f32
    %48 = vector.broadcast %cst_17 : f32 to vector<8x128xf32>
    %49 = arith.subf %48, %41 : vector<8x128xf32>
    %50 = arith.mulf %49, %47 : vector<8x128xf32>
    %51 = arith.mulf %41, %14 : vector<8x128xf32>
    %52 = arith.addf %50, %51 : vector<8x128xf32>
    %c7_i32 = arith.constant 7 : i32
    %53 = arith.subi %c7_i32, %15 : i32
    %54 = vector.broadcast %15 : i32 to vector<8x128xi32>
    %55 = vector.broadcast %53 : i32 to vector<8x128xi32>
    %56 = arith.select %12, %54, %55 : vector<8x128xi1>, vector<8x128xi32>
    %57 = arith.cmpi slt, %56, %9 : vector<8x128xi32>
    %58 = arith.select %57, %52, %14 : vector<8x128xi1>, vector<8x128xf32>
    %c1_i32 = arith.constant 1 : i32
    %59 = arith.addi %13, %c1_i32 : i32
    %60 = arith.index_cast %c1_i32 : i32 to index
    %c0_18 = arith.constant 0 : index
    %c0_19 = arith.constant 0 : index
    %61 = vector.load %arg1[%60, %c0_18, %c0_19] : memref<4x8x384xbf16, #tpu.memory_space<vmem>>, vector<1x8x384xbf16>
    %62 = vector.shape_cast %61 : vector<1x8x384xbf16> to vector<8x384xbf16>
    %63 = arith.extf %62 : vector<8x384xbf16> to vector<8x384xf32>
    %64 = arith.truncf %58 : vector<8x128xf32> to vector<8x128xbf16>
    %cst_20 = arith.constant dense<0.000000e+00> : vector<8x384xf32>
    %65 = tpu.matmul %64, %3, %cst_20 {dimension_numbers = #tpu.dot_dimension_numbers<[1], [0], [0], [1], [0, 0, 1, 1], [], []>} : vector<8x128xbf16>, vector<128x384xbf16>, vector<8x384xf32> -> vector<8x384xf32>
    %66 = vector.extract_strided_slice %63 {offsets = [0, 0], sizes = [8, 128], strides = [1, 1]} : vector<8x384xf32> to vector<8x128xf32>
    %67 = vector.extract_strided_slice %65 {offsets = [0, 0], sizes = [8, 128], strides = [1, 1]} : vector<8x384xf32> to vector<8x128xf32>
    %68 = arith.addf %66, %67 : vector<8x128xf32>
    %cst_21 = arith.constant 5.000000e-01 : f32
    %69 = vector.broadcast %cst_21 : f32 to vector<8x128xf32>
    %70 = arith.mulf %69, %68 : vector<8x128xf32>
    %71 = math.tanh %70 : vector<8x128xf32>
    %cst_22 = arith.constant 5.000000e-01 : f32
    %72 = vector.broadcast %cst_22 : f32 to vector<8x128xf32>
    %73 = arith.mulf %72, %71 : vector<8x128xf32>
    %cst_23 = arith.constant 5.000000e-01 : f32
    %74 = vector.broadcast %cst_23 : f32 to vector<8x128xf32>
    %75 = arith.addf %73, %74 : vector<8x128xf32>
    %76 = vector.extract_strided_slice %63 {offsets = [0, 128], sizes = [8, 128], strides = [1, 1]} : vector<8x384xf32> to vector<8x128xf32>
    %77 = vector.extract_strided_slice %65 {offsets = [0, 128], sizes = [8, 128], strides = [1, 1]} : vector<8x384xf32> to vector<8x128xf32>
    %78 = arith.addf %76, %77 : vector<8x128xf32>
    %cst_24 = arith.constant 5.000000e-01 : f32
    %79 = vector.broadcast %cst_24 : f32 to vector<8x128xf32>
    %80 = arith.mulf %79, %78 : vector<8x128xf32>
    %81 = math.tanh %80 : vector<8x128xf32>
    %cst_25 = arith.constant 5.000000e-01 : f32
    %82 = vector.broadcast %cst_25 : f32 to vector<8x128xf32>
    %83 = arith.mulf %82, %81 : vector<8x128xf32>
    %cst_26 = arith.constant 5.000000e-01 : f32
    %84 = vector.broadcast %cst_26 : f32 to vector<8x128xf32>
    %85 = arith.addf %83, %84 : vector<8x128xf32>
    %86 = vector.extract_strided_slice %63 {offsets = [0, 256], sizes = [8, 128], strides = [1, 1]} : vector<8x384xf32> to vector<8x128xf32>
    %87 = vector.extract_strided_slice %65 {offsets = [0, 256], sizes = [8, 128], strides = [1, 1]} : vector<8x384xf32> to vector<8x128xf32>
    %88 = arith.addf %87, %6 : vector<8x128xf32>
    %89 = arith.mulf %75, %88 : vector<8x128xf32>
    %90 = arith.addf %86, %89 : vector<8x128xf32>
    %91 = math.tanh %90 : vector<8x128xf32>
    %cst_27 = arith.constant 1.000000e+00 : f32
    %92 = vector.broadcast %cst_27 : f32 to vector<8x128xf32>
    %93 = arith.subf %92, %85 : vector<8x128xf32>
    %94 = arith.mulf %93, %91 : vector<8x128xf32>
    %95 = arith.mulf %85, %58 : vector<8x128xf32>
    %96 = arith.addf %94, %95 : vector<8x128xf32>
    %c7_i32_28 = arith.constant 7 : i32
    %97 = arith.subi %c7_i32_28, %59 : i32
    %98 = vector.broadcast %59 : i32 to vector<8x128xi32>
    %99 = vector.broadcast %97 : i32 to vector<8x128xi32>
    %100 = arith.select %12, %98, %99 : vector<8x128xi1>, vector<8x128xi32>
    %101 = arith.cmpi slt, %100, %9 : vector<8x128xi32>
    %102 = arith.select %101, %96, %58 : vector<8x128xi1>, vector<8x128xf32>
    %c2_i32 = arith.constant 2 : i32
    %103 = arith.addi %13, %c2_i32 : i32
    %104 = arith.index_cast %c2_i32 : i32 to index
    %c0_29 = arith.constant 0 : index
    %c0_30 = arith.constant 0 : index
    %105 = vector.load %arg1[%104, %c0_29, %c0_30] : memref<4x8x384xbf16, #tpu.memory_space<vmem>>, vector<1x8x384xbf16>
    %106 = vector.shape_cast %105 : vector<1x8x384xbf16> to vector<8x384xbf16>
    %107 = arith.extf %106 : vector<8x384xbf16> to vector<8x384xf32>
    %108 = arith.truncf %102 : vector<8x128xf32> to vector<8x128xbf16>
    %cst_31 = arith.constant dense<0.000000e+00> : vector<8x384xf32>
    %109 = tpu.matmul %108, %3, %cst_31 {dimension_numbers = #tpu.dot_dimension_numbers<[1], [0], [0], [1], [0, 0, 1, 1], [], []>} : vector<8x128xbf16>, vector<128x384xbf16>, vector<8x384xf32> -> vector<8x384xf32>
    %110 = vector.extract_strided_slice %107 {offsets = [0, 0], sizes = [8, 128], strides = [1, 1]} : vector<8x384xf32> to vector<8x128xf32>
    %111 = vector.extract_strided_slice %109 {offsets = [0, 0], sizes = [8, 128], strides = [1, 1]} : vector<8x384xf32> to vector<8x128xf32>
    %112 = arith.addf %110, %111 : vector<8x128xf32>
    %cst_32 = arith.constant 5.000000e-01 : f32
    %113 = vector.broadcast %cst_32 : f32 to vector<8x128xf32>
    %114 = arith.mulf %113, %112 : vector<8x128xf32>
    %115 = math.tanh %114 : vector<8x128xf32>
    %cst_33 = arith.constant 5.000000e-01 : f32
    %116 = vector.broadcast %cst_33 : f32 to vector<8x128xf32>
    %117 = arith.mulf %116, %115 : vector<8x128xf32>
    %cst_34 = arith.constant 5.000000e-01 : f32
    %118 = vector.broadcast %cst_34 : f32 to vector<8x128xf32>
    %119 = arith.addf %117, %118 : vector<8x128xf32>
    %120 = vector.extract_strided_slice %107 {offsets = [0, 128], sizes = [8, 128], strides = [1, 1]} : vector<8x384xf32> to vector<8x128xf32>
    %121 = vector.extract_strided_slice %109 {offsets = [0, 128], sizes = [8, 128], strides = [1, 1]} : vector<8x384xf32> to vector<8x128xf32>
    %122 = arith.addf %120, %121 : vector<8x128xf32>
    %cst_35 = arith.constant 5.000000e-01 : f32
    %123 = vector.broadcast %cst_35 : f32 to vector<8x128xf32>
    %124 = arith.mulf %123, %122 : vector<8x128xf32>
    %125 = math.tanh %124 : vector<8x128xf32>
    %cst_36 = arith.constant 5.000000e-01 : f32
    %126 = vector.broadcast %cst_36 : f32 to vector<8x128xf32>
    %127 = arith.mulf %126, %125 : vector<8x128xf32>
    %cst_37 = arith.constant 5.000000e-01 : f32
    %128 = vector.broadcast %cst_37 : f32 to vector<8x128xf32>
    %129 = arith.addf %127, %128 : vector<8x128xf32>
    %130 = vector.extract_strided_slice %107 {offsets = [0, 256], sizes = [8, 128], strides = [1, 1]} : vector<8x384xf32> to vector<8x128xf32>
    %131 = vector.extract_strided_slice %109 {offsets = [0, 256], sizes = [8, 128], strides = [1, 1]} : vector<8x384xf32> to vector<8x128xf32>
    %132 = arith.addf %131, %6 : vector<8x128xf32>
    %133 = arith.mulf %119, %132 : vector<8x128xf32>
    %134 = arith.addf %130, %133 : vector<8x128xf32>
    %135 = math.tanh %134 : vector<8x128xf32>
    %cst_38 = arith.constant 1.000000e+00 : f32
    %136 = vector.broadcast %cst_38 : f32 to vector<8x128xf32>
    %137 = arith.subf %136, %129 : vector<8x128xf32>
    %138 = arith.mulf %137, %135 : vector<8x128xf32>
    %139 = arith.mulf %129, %102 : vector<8x128xf32>
    %140 = arith.addf %138, %139 : vector<8x128xf32>
    %c7_i32_39 = arith.constant 7 : i32
    %141 = arith.subi %c7_i32_39, %103 : i32
    %142 = vector.broadcast %103 : i32 to vector<8x128xi32>
    %143 = vector.broadcast %141 : i32 to vector<8x128xi32>
    %144 = arith.select %12, %142, %143 : vector<8x128xi1>, vector<8x128xi32>
    %145 = arith.cmpi slt, %144, %9 : vector<8x128xi32>
    %146 = arith.select %145, %140, %102 : vector<8x128xi1>, vector<8x128xf32>
    %c3_i32 = arith.constant 3 : i32
    %147 = arith.addi %13, %c3_i32 : i32
    %148 = arith.index_cast %c3_i32 : i32 to index
    %c0_40 = arith.constant 0 : index
    %c0_41 = arith.constant 0 : index
    %149 = vector.load %arg1[%148, %c0_40, %c0_41] : memref<4x8x384xbf16, #tpu.memory_space<vmem>>, vector<1x8x384xbf16>
    %150 = vector.shape_cast %149 : vector<1x8x384xbf16> to vector<8x384xbf16>
    %151 = arith.extf %150 : vector<8x384xbf16> to vector<8x384xf32>
    %152 = arith.truncf %146 : vector<8x128xf32> to vector<8x128xbf16>
    %cst_42 = arith.constant dense<0.000000e+00> : vector<8x384xf32>
    %153 = tpu.matmul %152, %3, %cst_42 {dimension_numbers = #tpu.dot_dimension_numbers<[1], [0], [0], [1], [0, 0, 1, 1], [], []>} : vector<8x128xbf16>, vector<128x384xbf16>, vector<8x384xf32> -> vector<8x384xf32>
    %154 = vector.extract_strided_slice %151 {offsets = [0, 0], sizes = [8, 128], strides = [1, 1]} : vector<8x384xf32> to vector<8x128xf32>
    %155 = vector.extract_strided_slice %153 {offsets = [0, 0], sizes = [8, 128], strides = [1, 1]} : vector<8x384xf32> to vector<8x128xf32>
    %156 = arith.addf %154, %155 : vector<8x128xf32>
    %cst_43 = arith.constant 5.000000e-01 : f32
    %157 = vector.broadcast %cst_43 : f32 to vector<8x128xf32>
    %158 = arith.mulf %157, %156 : vector<8x128xf32>
    %159 = math.tanh %158 : vector<8x128xf32>
    %cst_44 = arith.constant 5.000000e-01 : f32
    %160 = vector.broadcast %cst_44 : f32 to vector<8x128xf32>
    %161 = arith.mulf %160, %159 : vector<8x128xf32>
    %cst_45 = arith.constant 5.000000e-01 : f32
    %162 = vector.broadcast %cst_45 : f32 to vector<8x128xf32>
    %163 = arith.addf %161, %162 : vector<8x128xf32>
    %164 = vector.extract_strided_slice %151 {offsets = [0, 128], sizes = [8, 128], strides = [1, 1]} : vector<8x384xf32> to vector<8x128xf32>
    %165 = vector.extract_strided_slice %153 {offsets = [0, 128], sizes = [8, 128], strides = [1, 1]} : vector<8x384xf32> to vector<8x128xf32>
    %166 = arith.addf %164, %165 : vector<8x128xf32>
    %cst_46 = arith.constant 5.000000e-01 : f32
    %167 = vector.broadcast %cst_46 : f32 to vector<8x128xf32>
    %168 = arith.mulf %167, %166 : vector<8x128xf32>
    %169 = math.tanh %168 : vector<8x128xf32>
    %cst_47 = arith.constant 5.000000e-01 : f32
    %170 = vector.broadcast %cst_47 : f32 to vector<8x128xf32>
    %171 = arith.mulf %170, %169 : vector<8x128xf32>
    %cst_48 = arith.constant 5.000000e-01 : f32
    %172 = vector.broadcast %cst_48 : f32 to vector<8x128xf32>
    %173 = arith.addf %171, %172 : vector<8x128xf32>
    %174 = vector.extract_strided_slice %151 {offsets = [0, 256], sizes = [8, 128], strides = [1, 1]} : vector<8x384xf32> to vector<8x128xf32>
    %175 = vector.extract_strided_slice %153 {offsets = [0, 256], sizes = [8, 128], strides = [1, 1]} : vector<8x384xf32> to vector<8x128xf32>
    %176 = arith.addf %175, %6 : vector<8x128xf32>
    %177 = arith.mulf %163, %176 : vector<8x128xf32>
    %178 = arith.addf %174, %177 : vector<8x128xf32>
    %179 = math.tanh %178 : vector<8x128xf32>
    %cst_49 = arith.constant 1.000000e+00 : f32
    %180 = vector.broadcast %cst_49 : f32 to vector<8x128xf32>
    %181 = arith.subf %180, %173 : vector<8x128xf32>
    %182 = arith.mulf %181, %179 : vector<8x128xf32>
    %183 = arith.mulf %173, %146 : vector<8x128xf32>
    %184 = arith.addf %182, %183 : vector<8x128xf32>
    %c7_i32_50 = arith.constant 7 : i32
    %185 = arith.subi %c7_i32_50, %147 : i32
    %186 = vector.broadcast %147 : i32 to vector<8x128xi32>
    %187 = vector.broadcast %185 : i32 to vector<8x128xi32>
    %188 = arith.select %12, %186, %187 : vector<8x128xi1>, vector<8x128xi32>
    %189 = arith.cmpi slt, %188, %9 : vector<8x128xi32>
    %190 = arith.select %189, %184, %146 : vector<8x128xi1>, vector<8x128xf32>
    %c4_i32_51 = arith.constant 4 : i32
    %c0_52 = arith.constant 0 : index
    %c0_53 = arith.constant 0 : index
    %191 = vector.load %arg5[%c0_52, %c0_53] : memref<8x128xf32, #tpu.memory_space<vmem>>, vector<8x128xf32>
    tpu.vector_store %arg5[%c0_52, %c0_53], %190 {strides = array<i32>} : memref<8x128xf32, #tpu.memory_space<vmem>>, vector<8x128xf32>,
    return
  }
  func.func @transform_0(%arg0: i32) -> (i32, i32, i32) {
    %c0_i32 = arith.constant 0 : i32
    %c0_i32_0 = arith.constant 0 : i32
    %c0_i32_1 = arith.constant 0 : i32
    return %arg0, %c0_i32, %c0_i32_0 : i32, i32, i32
  }
  func.func @transform_1(%arg0: i32) -> (i32, i32) {
    %c0_i32 = arith.constant 0 : i32
    %c0_i32_0 = arith.constant 0 : i32
    %c0_i32_1 = arith.constant 0 : i32
    return %c0_i32, %c0_i32_0 : i32, i32
  }
  func.func @transform_2(%arg0: i32) -> (i32, i32) {
    %c0_i32 = arith.constant 0 : i32
    %c0_i32_0 = arith.constant 0 : i32
    %c0_i32_1 = arith.constant 0 : i32
    return %c0_i32, %c0_i32_0 : i32, i32
  }
  func.func @transform_3(%arg0: i32) -> (i32, i32) {
    %c0_i32 = arith.constant 0 : i32
    %c0_i32_0 = arith.constant 0 : i32
    %c0_i32_1 = arith.constant 0 : i32
    return %c0_i32, %c0_i32_0 : i32, i32
  }
  func.func @transform_4(%arg0: i32) -> (i32, i32) {
    %c0_i32 = arith.constant 0 : i32
    %c0_i32_0 = arith.constant 0 : i32
    %c0_i32_1 = arith.constant 0 : i32
    return %c0_i32, %c0_i32_0 : i32, i32
  }
}

</mosaic_0001>

<bundles_post_ra>
// kernel: tpu_custom_call.1
= control target key start
LH: loop header
LB: loop body
LE: loop exit
PB: predicated region body
PF: predicated region fallthrough
CT: control target
= control target key end

     0   :  { %9 = vsyncpa [#allocation3], 0  ;;  %s1471_s0 = inlined_call_operand.hbm [shape: bf16[8,8,384], index: 0, kind: input, shape index: {}]   ;;  %s1472_s1 = inlined_call_operand.vmem [shape: s32[8,1], index: 1, kind: input, shape index: {}]   ;;  %s1473_s2 = inlined_call_operand.hbm [shape: bf16[128,384], index: 2, kind: input, shape index: {}]   ;;  %s1474_s3 = inlined_call_operand.vmem [shape: f32[1,128], index: 3, kind: input, shape index: {}]   ;;  %s1475_s4 = inlined_call_operand.hbm [shape: f32[8,128], index: 4, kind: output, shape index: {}]  }
   0x1   :  { %11 = vsyncpa [#allocation3 + $0x1], 0 }
   0x2   :  { %12 = vsyncpa [#allocation6], 0 }
   0x3   :  { %13 = vsyncpa [#allocation4], 0  ;;  %s1149_s15 = smov 0   ;;  %s1151_s16 = smov 0  }
   0x4   :  { %s1153_s17 = smov 0   ;;  %s1155_s18 = smov 0  }
   0x5 LB: > { %s1168_s19 = sadd.s32 4294967295, %s1116_s18   ;;  %p39_p0 = scmp.ne.s32.totalorder %s1108_s16, %s1104_s15  ;;  %s1116_s18 = sphi %s1155_s18, %s1482_s18   ;;  %s1112_s17 = sphi %s1153_s17, %s1481_s17   ;;  %s1108_s16 = sphi %s1151_s16, %s1480_s16   ;;  %s1104_s15 = sphi %s1149_s15, %s1479_s15  }
   0x6   : > { %p40_p1 = scmp.eq.s32.totalorder %s1168_s19, 0  ;;  %p756_p2 = scmp.ge.s32.totalorder %s1116_s18, 1 }
   0x7   : > { %p134_p3 = scmp.lt.s32.totalorder %s1116_s18, 3  ;;  %p757_p4 = scmp.ne.s32.totalorder %s1168_s19, 0 }
   0x8   : > { %p1177_p5 = por %p40_p1, %p39_p0  ;;  %s148_s23 = sshll.u32 %s1473_s2, 4  ;;  %s149_s23 = int_to_ptr.hbm [resolvable:$true] %s148_s23 }
   0x9   : > { %p1184_p6 = pnand %p756_p2, %p134_p3  ;;  %s1118_s25 = smov [#allocation5]  }
   0xa   : > { %s150_s26 = sshll.u32 %s1118_s25, 4  ;;  %s1193_s27 = sadd.s32 1, %s1116_s18   ;;  %s151_s26 = int_to_ptr.vmem [resolvable:$true] %s150_s26 }
   0xb   : > { %p909_p7 = pneg %p1184_p6  ;;  %s1119_s28 = smov 192  }
   0xc   : > { %s1120_s29 = smov 12   ;;  %s23_s30 = ssub.s32 %s1116_s18, %s1193_s27 }
   0xd   : > { %p910_p8 = pnand %p909_p7, %p40_p1  ;;  %s26_s5 = sadd.s32 1, %s1112_s17 }
   0xe   : > { %p24_p9 = scmp.eq.s32.totalorder %s23_s30, 0  ;;  %p33_p10 = scmp.ne.s32.totalorder %s1112_s17, %s1108_s16 }
   0xf   : > { %912 = dma.hbm_to_vmem [thread:$0]  (!%p910_p8), %s149_s23, 3072, %s151_s26, [#allocation6], %s1119_s28, %s1119_s28, %s1120_s29  }
  0x10   : > { %p34_p11 = scmp.eq.s32.totalorder %s1116_s18, 0  ;;  %p918_p12 = scmp.lt.s32.totalorder %s1116_s18, 2 }
  0x11   : > { %s1206_s6 = scalar_select %p24_p9, %s1112_s17, %s26_s5  }
  0x12   : > { %p35_p13 = por %p34_p11, %p33_p10  ;;  %s167_s7 = sand.u32 1, %s1112_s17  }
  0x13   : > { %s896_s8 = smul.u32 48, %s167_s7  ;;  %s168_s22 = scalar_lea.sflag [#allocation3], %s167_s7 }
  0x14   : > { %s897_s9 = smul.u32 48, %s1116_s18  ;;  %p1210_p0 = pnand %p918_p12, %p35_p13 }
  0x15   : > { %s171_s14 = scalar_lea.vmem [#allocation2], %s896_s8  ;;  %s1023_s30 = scalar_lea.hbm %s1471_s0, 96 }
  0x16   : > { %s177_s13 = scalar_lea.hbm %s1471_s0, %s897_s9  ;;  %s180_s15 = sshll.u32 %s171_s14, 4  ;;  %s181_s15 = int_to_ptr.vmem [resolvable:$true] %s180_s15 }
  0x17   : > { %s178_s21 = sshll.u32 %s177_s13, 4  ;;  %p1020_p3 = pneg %p1210_p0  ;;  %s179_s21 = int_to_ptr.hbm [resolvable:$true] %s178_s21 }
  0x18   : > { %s1016_s23 = sshra.s32 %s179_s21, 4  ;;  %s1017_s23 = int_to_ptr.hbm [resolvable:$true] %s1016_s23 }
  0x19   : > { %s1018_s25 = scalar_lea.hbm %s1017_s23, 48  ;;  %p1024_p9 = scmp.lt.s32.totalorder %s1017_s23, %s1471_s0 }
  0x1a   : > { %p1019_p2 = scmp.ne.s32.totalorder %s1017_s23, %s1018_s25  ;;  %p1025_p10 = scmp.lt.s32.totalorder %s1023_s30, %s1018_s25 }
  0x1c   : > { %p1021_p7 = pnand %p1020_p3, %p1019_p2  ;;  %p1026_p11 = por %p1025_p10, %p1024_p9 }
  0x1e   : > { %p1022_p8 = pneg %p1021_p7 }
  0x20   : > { %p1027_p12 = pnand %p1026_p11, %p1022_p8 }
  0x22   : > { %1030 = shalt.err (!%p1027_p12)
}
  0x23   : > { %916 = dma.hbm_to_vmem [thread:$0]  (!%p1210_p0), %s179_s21, 768, %s181_s15, %s168_s22, %s1119_s28, %s1119_s28, %s1120_s29  }
  0x24   : > { %192 = sbr.rel (%p1184_p6) target bundleno = 735 (0x2df), region = 36  ;;  %s194_s7 = sand.u32 (!%p1184_p6), 1, %s1108_s16  }
  0x25   : > { %s898_s8 = smul.u32 (!%p1184_p6), 48, %s194_s7  ;;  %s195_s11 = scalar_lea.sflag (!%p1184_p6), [#allocation3], %s194_s7 }
  0x27   : > { %s1233_s12 = scalar_lea.vmem (!%p1184_p6), [#allocation2], %s898_s8 }
  0x29   : > { %1091 = dma.done.wait (%p1177_p5), %s195_s11, 768  }
  0x2a   : > { %1093 = vsyncadd (%p1177_p5), %s195_s11, 4294966528 }
  0x2b   : > { %1095 = dma.done.wait (%p40_p1), [#allocation6], 3072  }
  0x2c   : > { %1097 = vsyncadd (%p40_p1), [#allocation6], 4294964224  ;;  %228 = sbr.rel (%p757_p4) target bundleno = 51 (0x33), region = 48 }
  0x31   : > { %v1121_v0 = vmov 0.0  }
  0x32   : > { %229 = vst [vmem:[#allocation7] sm:$0xff] %v1121_v0 }
  0x33 PF: > { %v852_v1 = vld [vmem:[#allocation5 + $0xa8] sm:$0xf]  ;;  %v894_v2 = vld [vmem:[#allocation5 + $0xb0] sm:$0xf0]  ;;  %v860_v3 = vld [vmem:[#allocation5 + $0xb0] sm:$0xf] }
  0x34   : > { %v1245_v4 = vor.u32 %v894_v2, %v852_v1  ;;  %v895_v5 = vld [vmem:[#allocation5 + $0xb8] sm:$0xf0]  ;;  %v893_v6 = vld [vmem:[#allocation5 + $0xac] sm:$0xf]  ;;  %v854_v7 = vld [vmem:[#allocation5 + $0xb4] sm:$0xf0] }
  0x35   : > { %v1247_v8 = vor.u32 %v895_v5, %v860_v3  ;;  %v1249_v9 = vor.u32 %v893_v6, %v854_v7  ;;  %v840_v10 = vld [vmem:[#allocation5 + $0x90] sm:$0xf]  ;;  %v891_v11 = vld [vmem:[#allocation5 + $0x98] sm:$0xf0]  ;;  %v848_v12 = vld [vmem:[#allocation5 + $0x98] sm:$0xf] }
  0x36   : > { %409 = vmatpush.bf16.msra.mxu0 %v1245_v4  ;;  %v1252_v13 = vor.u32 %v891_v11, %v840_v10  ;;  %v892_v14 = vld [vmem:[#allocation5 + $0xa0] sm:$0xf0]  ;;  %v890_v15 = vld [vmem:[#allocation5 + $0x94] sm:$0xf]  ;;  %v842_v16 = vld [vmem:[#allocation5 + $0x9c] sm:$0xf0]  ;;  %480 = vmatpush.bf16.msra.mxu3 %v1245_v4 }
  0x37   : > { %435 = vmatpush.bf16.msra.mxu2 %v1247_v8  ;;  %422 = vmatpush.bf16.msra.mxu1 %v1249_v9  ;;  %v1257_v17 = vor.u32 %v892_v14, %v848_v12  ;;  %v1259_v18 = vor.u32 %v890_v15, %v842_v16  ;;  %v828_v19 = vld [vmem:[#allocation5 + $0x78] sm:$0xf]  ;;  %v888_v20 = vld [vmem:[#allocation5 + $0x80] sm:$0xf0]  ;;  %v836_v21 = vld [vmem:[#allocation5 + $0x80] sm:$0xf] }
  0x38   : > { %v889_v22 = vld [vmem:[#allocation5 + $0x88] sm:$0xf0]  ;;  %v887_v23 = vld [vmem:[#allocation5 + $0x7c] sm:$0xf]  ;;  %v830_v24 = vld [vmem:[#allocation5 + $0x84] sm:$0xf0]  ;;  %v1262_v25 = vor.u32 %v888_v20, %v828_v19 }
  0x39   : > { %v1267_v26 = vor.u32 %v889_v22, %v836_v21  ;;  %v1269_v27 = vor.u32 %v887_v23, %v830_v24  ;;  %v816_v28 = vld [vmem:[#allocation5 + $0x60] sm:$0xf]  ;;  %v885_v29 = vld [vmem:[#allocation5 + $0x68] sm:$0xf0]  ;;  %v824_v30 = vld [vmem:[#allocation5 + $0x68] sm:$0xf] }
  0x3a   : > { %410 = vmatpush.bf16.msra.mxu0 %v1252_v13  ;;  %481 = vmatpush.bf16.msra.mxu3 %v1252_v13  ;;  %v886_v31 = vld [vmem:[#allocation5 + $0x70] sm:$0xf0]  ;;  %v884_v32 = vld [vmem:[#allocation5 + $0x64] sm:$0xf]  ;;  %v818_v33 = vld [vmem:[#allocation5 + $0x6c] sm:$0xf0]  ;;  %v1272_v34 = vor.u32 %v885_v29, %v816_v28 }
  0x3b   : > { %436 = vmatpush.bf16.msra.mxu2 %v1257_v17  ;;  %423 = vmatpush.bf16.msra.mxu1 %v1259_v18  ;;  %v1277_v35 = vor.u32 %v886_v31, %v824_v30  ;;  %v1279_v36 = vor.u32 %v884_v32, %v818_v33  ;;  %v804_v37 = vld [vmem:[#allocation5 + $0x48] sm:$0xf]  ;;  %v882_v38 = vld [vmem:[#allocation5 + $0x50] sm:$0xf0]  ;;  %v812_v39 = vld [vmem:[#allocation5 + $0x50] sm:$0xf] }
  0x3c   : > { %v883_v40 = vld [vmem:[#allocation5 + $0x58] sm:$0xf0]  ;;  %v881_v41 = vld [vmem:[#allocation5 + $0x4c] sm:$0xf]  ;;  %v806_v42 = vld [vmem:[#allocation5 + $0x54] sm:$0xf0]  ;;  %v1282_v43 = vor.u32 %v882_v38, %v804_v37 }
  0x3d   : > { %v792_v44 = vld [vmem:[#allocation5 + $0x30] sm:$0xf]  ;;  %v879_v45 = vld [vmem:[#allocation5 + $0x38] sm:$0xf0]  ;;  %v800_v46 = vld [vmem:[#allocation5 + $0x38] sm:$0xf]  ;;  %v1287_v47 = vor.u32 %v883_v40, %v812_v39  ;;  %v1289_v48 = vor.u32 %v881_v41, %v806_v42 }
  0x3e   : > { %411 = vmatpush.bf16.msra.mxu0 %v1262_v25  ;;  %482 = vmatpush.bf16.msra.mxu3 %v1262_v25  ;;  %v880_v49 = vld [vmem:[#allocation5 + $0x40] sm:$0xf0]  ;;  %v878_v51 = vld [vmem:[#allocation5 + $0x34] sm:$0xf]  ;;  %v794_v52 = vld [vmem:[#allocation5 + $0x3c] sm:$0xf0]  ;;  %v1295_v54 = vor.u32 %v879_v45, %v792_v44 }
  0x3f   : > { %437 = vmatpush.bf16.msra.mxu2 %v1267_v26  ;;  %424 = vmatpush.bf16.msra.mxu1 %v1269_v27  ;;  %v266_v50 = vld [vmem:[%s1472_s1] sm:$0xff]  ;;  %v1122_v53 = vmov 0   ;;  %v1300_v55 = vor.u32 %v880_v49, %v800_v46  ;;  %v1302_v56 = vor.u32 %v878_v51, %v794_v52  ;;  %v780_v57 = vld [vmem:[#allocation5 + $0x18] sm:$0xf]  ;;  %v877_v60 = vld [vmem:[#allocation5 + $0x28] sm:$0xf0] }
  0x40   : > { %960 = vset.pattern.permute.xlu0 %v1122_v53  ;;  %v876_v58 = vld [vmem:[#allocation5 + $0x20] sm:$0xf0]  ;;  %v788_v59 = vld [vmem:[#allocation5 + $0x20] sm:$0xf]  ;;  %v875_v61 = vld [vmem:[#allocation5 + $0x1c] sm:$0xf] }
  0x41   : > { %268 = vperm.xlu0 %960, %v266_v50   ;;  %v782_v62 = vld [vmem:[#allocation5 + $0x24] sm:$0xf0]  ;;  %v1305_v63 = vor.u32 %v876_v58, %v780_v57  ;;  %v1310_v0 = vor.u32 %v877_v60, %v788_v59  ;;  %v768_v2 = vld [vmem:[#allocation5] sm:$0xf]  ;;  %v873_v3 = vld [vmem:[#allocation5 + $0x8] sm:$0xf0] }
  0x42   : > { %412 = vmatpush.bf16.msra.mxu0 %v1272_v34  ;;  %483 = vmatpush.bf16.msra.mxu3 %v1272_v34  ;;  %v1312_v1 = vor.u32 %v875_v61, %v782_v62  ;;  %v776_v5 = vld [vmem:[#allocation5 + $0x8] sm:$0xf]  ;;  %v874_v6 = vld [vmem:[#allocation5 + $0x10] sm:$0xf0]  ;;  %v872_v7 = vld [vmem:[#allocation5 + $0x4] sm:$0xf]  ;;  %v1315_v11 = vor.u32 %v873_v3, %v768_v2 }
  0x43   : > { %438 = vmatpush.bf16.msra.mxu2 %v1277_v35  ;;  %425 = vmatpush.bf16.msra.mxu1 %v1279_v36  ;;  %v770_v10 = vld [vmem:[#allocation5 + $0xc] sm:$0xf0]  ;;  %v1317_v12 = vld [vmem:[#allocation7] sm:$0xff]  ;;  %v1322_v14 = vor.u32 %v874_v6, %v776_v5  ;;  %s1389_s28 = sshll.u32 %s1168_s19, 2  ;;  %s1123_s18 = smov [#allocation7]  }
  0x44   : > { %v1324_v15 = vor.u32 %v872_v7, %v770_v10  ;;  %v280_v16 = vpack.c.bf16 %v1317_v12, %v1317_v12  ;;  %s472_s29 = sadd.s32 1, %s1389_s28  ;;  %s537_s10 = ssub.s32 6, %s1389_s28  ;;  %v1418_v39 = vld [vmem:[%s1474_s3] ss:$0 sm:$0xff] }
  0x45   : > { %s543_s13 = sadd.s32 2, %s1389_s28  ;;  %s608_s14 = ssub.s32 5, %s1389_s28  ;;  %v539_v19 = vstv %s537_s10  ;;  %v862_v3 = vld [vmem:[%s1233_s12 + $0xc] sm:$0xff] }
  0x46   : > { %413 = vmatpush.bf16.msra.mxu0 %v1282_v43  ;;  %484 = vmatpush.bf16.msra.mxu3 %v1282_v43  ;;  %s614_s15 = sadd.s32 3, %s1389_s28  ;;  %s679_s21 = ssub.s32 4, %s1389_s28  ;;  %v609_v20 = vstv %s543_s13  ;;  %v610_v21 = vstv %s608_s14  ;;  %v477_v7 = vunpack.c.h.bf16 %v862_v3 }
  0x47   : > { %439 = vmatpush.bf16.msra.mxu2 %v1287_v47  ;;  %426 = vmatpush.bf16.msra.mxu1 %v1289_v48  ;;  %v680_v22 = vstv %s614_s15  ;;  %s466_s25 = ssub.s32 7, %s1389_s28  ;;  %s692_s26 = sshll.u32 %s1123_s18, 4  ;;  %s693_s26 = int_to_ptr.vmem [resolvable:$true] %s692_s26 }
  0x48   : > { %v468_v57 = vstv %s466_s25  ;;  %s694_s9 = sshll.u32 %s1475_s4, 4  ;;  %p920_p1 = scmp.eq.s32.totalorder %s1168_s19, 1  ;;  %s695_s9 = int_to_ptr.hbm [resolvable:$true] %s694_s9 }
  0x4a   : > { %414 = vmatpush.bf16.msra.mxu0 %v1295_v54  ;;  %485 = vmatpush.bf16.msra.mxu3 %v1295_v54 }
  0x4b   : > { %440 = vmatpush.bf16.msra.mxu2 %v1300_v55  ;;  %427 = vmatpush.bf16.msra.mxu1 %v1302_v56 }
  0x4e   : > { %415 = vmatpush.bf16.msra.mxu0 %v1305_v63  ;;  %486 = vmatpush.bf16.msra.mxu3 %v1305_v63 }
  0x4f   : > { %441 = vmatpush.bf16.msra.mxu2 %v1310_v0  ;;  %428 = vmatpush.bf16.msra.mxu1 %v1312_v1 }
  0x52   : > { %416 = vmatpush.bf16.msra.mxu0 %v1315_v11  ;;  %487 = vmatpush.bf16.msra.mxu3 %v1315_v11 }
  0x53   : > { %442 = vmatpush.bf16.msra.mxu2 %v1322_v14  ;;  %429 = vmatpush.bf16.msra.mxu1 %v1324_v15 }
  0x55   : > { %417 = vmatmul.bf16.vlgmr.msra.gmra.mxu0 %v280_v16 }
  0x56   : > { %493 = vmatpush.bf16.msrb.mxu0 %v1249_v9  ;;  %443 = vmatmul.bf16.vlgmr.msra.gmra.mxu2 %v280_v16 }
  0x57   : > { %506 = vmatpush.bf16.msrb.mxu1 %v1247_v8  ;;  %551 = vmatpush.bf16.msrb.mxu2 %v1245_v4 }
  0x58   : > { %430 = vmatmul.bf16.vlgmr.msra.gmra.mxu1 %v280_v16  ;;  %564 = vmatpush.bf16.msrb.mxu3 %v1249_v9 }
  0x5a   : > { %494 = vmatpush.bf16.msrb.mxu0 %v1259_v18 }
  0x5b   : > { %507 = vmatpush.bf16.msrb.mxu1 %v1257_v17  ;;  %552 = vmatpush.bf16.msrb.mxu2 %v1252_v13 }
  0x5c   : > { %565 = vmatpush.bf16.msrb.mxu3 %v1259_v18 }
  0x5e   : > { %495 = vmatpush.bf16.msrb.mxu0 %v1269_v27 }
  0x5f   : > { %508 = vmatpush.bf16.msrb.mxu1 %v1267_v26  ;;  %553 = vmatpush.bf16.msrb.mxu2 %v1262_v25 }
  0x60   : > { %566 = vmatpush.bf16.msrb.mxu3 %v1269_v27 }
  0x62   : > { %496 = vmatpush.bf16.msrb.mxu0 %v1279_v36 }
  0x63   : > { %509 = vmatpush.bf16.msrb.mxu1 %v1277_v35  ;;  %554 = vmatpush.bf16.msrb.mxu2 %v1272_v34 }
  0x64   : > { %567 = vmatpush.bf16.msrb.mxu3 %v1279_v36 }
  0x66   : > { %497 = vmatpush.bf16.msrb.mxu0 %v1289_v48 }
  0x67   : > { %510 = vmatpush.bf16.msrb.mxu1 %v1287_v47  ;;  %555 = vmatpush.bf16.msrb.mxu2 %v1282_v43 }
  0x68   : > { %568 = vmatpush.bf16.msrb.mxu3 %v1289_v48 }
  0x6a   : > { %498 = vmatpush.bf16.msrb.mxu0 %v1302_v56 }
  0x6b   : > { %511 = vmatpush.bf16.msrb.mxu1 %v1300_v55  ;;  %556 = vmatpush.bf16.msrb.mxu2 %v1295_v54 }
  0x6c   : > { %569 = vmatpush.bf16.msrb.mxu3 %v1302_v56 }
  0x6e   : > { %499 = vmatpush.bf16.msrb.mxu0 %v1312_v1 }
  0x6f   : > { %512 = vmatpush.bf16.msrb.mxu1 %v1310_v0  ;;  %557 = vmatpush.bf16.msrb.mxu2 %v1305_v63 }
  0x70   : > { %570 = vmatpush.bf16.msrb.mxu3 %v1312_v1 }
  0x72   : > { %500 = vmatpush.bf16.msrb.mxu0 %v1324_v15 }
  0x73   : > { %513 = vmatpush.bf16.msrb.mxu1 %v1322_v14  ;;  %558 = vmatpush.bf16.msrb.mxu2 %v1315_v11 }
  0x74   : > { %571 = vmatpush.bf16.msrb.mxu3 %v1324_v15 }
  0x76   : > { %577 = vmatpush.bf16.msra.mxu0 %v1247_v8 }
  0x77   : > { %622 = vmatpush.bf16.msra.mxu1 %v1245_v4  ;;  %635 = vmatpush.bf16.msra.mxu2 %v1249_v9  ;;  %v270_v4 = vlaneseq  ;;  %v275_v9 = vld [vmem:[%s1233_s12] sm:$0xff] }
  0x78   : > { %v277_v24 = vunpack.c.l.bf16 %v275_v9 }
  0x7a   : > { %578 = vmatpush.bf16.msra.mxu0 %v1257_v17 }
  0x7b   : > { %623 = vmatpush.bf16.msra.mxu1 %v1252_v13  ;;  %636 = vmatpush.bf16.msra.mxu2 %v1259_v18  ;;  %v271_v13 = vand.u32 127, %v270_v4  ;;  %v538_v18 = vstv %s472_s29 }
  0x7d   : > { %vm272_vm0 = vcmp.lt.s32.totalorder %v271_v13, 32 }
  0x7e   : > { %579 = vmatpush.bf16.msra.mxu0 %v1267_v26  ;;  %v1401_v28 = vsel %vm272_vm0, %v538_v18, %v539_v19  ;;  %v1404_v29 = vsel %vm272_vm0, %v609_v20, %v610_v21 }
  0x7f   : > { %624 = vmatpush.bf16.msra.mxu1 %v1262_v25  ;;  %637 = vmatpush.bf16.msra.mxu2 %v1269_v27  ;;  %v681_v25 = vstv %s679_s21  ;;  %v278_v27 = vunpack.c.h.bf16 %v275_v9 }
  0x80   : > { %v1407_v30 = vsel %vm272_vm0, %v680_v22, %v681_v25 }
  0x82   : > { %580 = vmatpush.bf16.msra.mxu0 %v1277_v35 }
  0x83   : > { %625 = vmatpush.bf16.msra.mxu1 %v1272_v34  ;;  %638 = vmatpush.bf16.msra.mxu2 %v1279_v36 }
  0x86   : > { %581 = vmatpush.bf16.msra.mxu0 %v1287_v47 }
  0x87   : > { %626 = vmatpush.bf16.msra.mxu1 %v1282_v43  ;;  %639 = vmatpush.bf16.msra.mxu2 %v1289_v48  ;;  %v276_v43 = vld [vmem:[%s1233_s12 + $0x8] sm:$0xf] }
  0x88   : > { %v279_v49 = vunpack.c.l.bf16 %v276_v43 }
  0x8a   : > { %582 = vmatpush.bf16.msra.mxu0 %v1300_v55 }
  0x8b   : > { %627 = vmatpush.bf16.msra.mxu1 %v1295_v54  ;;  %640 = vmatpush.bf16.msra.mxu2 %v1302_v56  ;;  %v467_v56 = vstv %s1389_s28 }
  0x8c   : > { %v469_v59 = vsel %vm272_vm0, %v467_v56, %v468_v57 }
  0x8e   : > { %583 = vmatpush.bf16.msra.mxu0 %v1310_v0 }
  0x8f   : > { %628 = vmatpush.bf16.msra.mxu1 %v1305_v63  ;;  %641 = vmatpush.bf16.msra.mxu2 %v1312_v1 }
  0x92   : > { %584 = vmatpush.bf16.msra.mxu0 %v1322_v14 }
  0x93   : > { %629 = vmatpush.bf16.msra.mxu1 %v1315_v11  ;;  %642 = vmatpush.bf16.msra.mxu2 %v1324_v15 }
  0xb3   : > { %v1398_v23 = vpop.permute.xlu0 %268 }
  0xb4   : > { %vm541_vm1 = vcmp.lt.s32.totalorder %v1401_v28, %v1398_v23  ;;  %vm612_vm2 = vcmp.lt.s32.totalorder %v1404_v29, %v1398_v23  ;;  %vm683_vm3 = vcmp.lt.s32.totalorder %v1407_v30, %v1398_v23  ;;  %vm470_vm4 = vcmp.lt.s32.totalorder %v469_v59, %v1398_v23  ;;  %v867_v29 = vld [vmem:[%s1233_s12 + $0x2c] sm:$0xf] }
  0xd2   : > { %v418_v31 = vpop.f32.mrf.mxu0 }
  0xd3   : > { %v448_v32 = vadd.f32 %v418_v31, %v277_v24 }
  0xd5   : > { %v431_v33 = vpop.f32.mrf.mxu1  ;;  %v449_v36 = vmul.f32 0.5, %v448_v32 }
  0xd6   : > { %v453_v34 = vadd.f32 %v431_v33, %v278_v27 }
  0xd7   : > { %962 = vtanh.f32 %v449_v36 }
  0xd8   : > { %v454_v37 = vmul.f32 0.5, %v453_v34  ;;  %v864_v34 = vld [vmem:[%s1233_s12 + $0x18] sm:$0xff] }
  0xd9   : > { %v444_v38 = vpop.f32.mrf.mxu2 }
  0xda   : > { %964 = vtanh.f32 %v454_v37  ;;  %v420_v40 = vpop.f32.mrf.mxu0  ;;  %v458_v46 = vadd.f32 %v1418_v39, %v444_v38  ;;  %v547_v37 = vunpack.c.l.bf16 %v864_v34  ;;  %v548_v38 = vunpack.c.h.bf16 %v864_v34 }
  0xdd   : > { %v433_v41 = vpop.f32.mrf.mxu1  ;;  %v963_v42 = vpop.eup %962 }
  0xde   : > { %v451_v45 = vmul.f32 0.5, %v963_v42 }
  0xe0   : > { %v965_v44 = vpop.eup %964  ;;  %v452_v48 = vadd.f32 0.5, %v451_v45 }
  0xe1   : > { %v456_v50 = vmul.f32 0.5, %v965_v44  ;;  %v446_v51 = vpop.f32.mrf.mxu2 }
  0xe2   : > { %v459_v52 = vmul.f32 %v458_v46, %v452_v48 }
  0xe3   : > { %v457_v54 = vadd.f32 0.5, %v456_v50  ;;  %v865_v50 = vld [vmem:[%s1233_s12 + $0x20] sm:$0xf] }
  0xe4   : > { %v460_v53 = vadd.f32 %v459_v52, %v279_v49 }
  0xe5   : > { %v462_v58 = vsub.f32 1.0, %v457_v54  ;;  %v464_v61 = vmul.f32 %v457_v54, %v1317_v12  ;;  %v549_v54 = vunpack.c.l.bf16 %v865_v50 }
  0xe6   : > { %966 = vtanh.f32 %v460_v53 }
  0xec   : > { %v967_v60 = vpop.eup %966 }
  0xed   : > { %v463_v62 = vmul.f32 %v967_v60, %v462_v58 }
  0xef   : > { %v465_v63 = vadd.f32 %v464_v61, %v463_v62 }
  0xf1   : > { %v471_v1 = vsel %vm470_vm4, %v465_v63, %v1317_v12 }
  0xf2   : > { %v479_v2 = vpack.c.bf16 %v471_v1, %v471_v1 }
  0xf4   : > { %488 = vmatmul.bf16.vlgmr.msra.gmra.mxu3 %v479_v2  ;;  %501 = vmatmul.bf16.vlgmr.msrb.gmra.mxu0 %v479_v2 }
  0xf5   : > { %514 = vmatmul.bf16.vlgmr.msrb.gmra.mxu1 %v479_v2  ;;  %648 = vmatpush.bf16.msra.mxu3 %v1247_v8  ;;  %v476_v8 = vunpack.c.l.bf16 %v862_v3 }
  0xf9   : > { %649 = vmatpush.bf16.msra.mxu3 %v1257_v17 }
  0xfd   : > { %650 = vmatpush.bf16.msra.mxu3 %v1267_v26 }
 0x101   : > { %651 = vmatpush.bf16.msra.mxu3 %v1277_v35 }
 0x105   : > { %652 = vmatpush.bf16.msra.mxu3 %v1287_v47 }
 0x109   : > { %653 = vmatpush.bf16.msra.mxu3 %v1300_v55 }
 0x10d   : > { %654 = vmatpush.bf16.msra.mxu3 %v1310_v0  ;;  %v863_v0 = vld [vmem:[%s1233_s12 + $0x14] sm:$0xf] }
 0x10e   : > { %v478_v9 = vunpack.c.l.bf16 %v863_v0 }
 0x111   : > { %655 = vmatpush.bf16.msra.mxu3 %v1322_v14 }
 0x171   : > { %v502_v5 = vpop.f32.mrf.mxu0 }
 0x172   : > { %v515_v6 = vpop.f32.mrf.mxu1  ;;  %v524_v10 = vadd.f32 %v502_v5, %v477_v7 }
 0x173   : > { %v529_v4 = vadd.f32 %v1418_v39, %v515_v6  ;;  %v866_v6 = vld [vmem:[%s1233_s12 + $0x24] sm:$0xff] }
 0x174   : > { %v525_v15 = vmul.f32 0.5, %v524_v10  ;;  %v618_v7 = vunpack.c.l.bf16 %v866_v6 }
 0x177   : > { %v489_v17 = vpop.f32.mrf.mxu3 }
 0x178   : > { %v519_v11 = vadd.f32 %v489_v17, %v476_v8 }
 0x179   : > { %v504_v26 = vpop.f32.mrf.mxu0 }
 0x17a   : > { %v520_v12 = vmul.f32 0.5, %v519_v11  ;;  %v517_v35 = vpop.f32.mrf.mxu1  ;;  %v619_v11 = vunpack.c.h.bf16 %v866_v6 }
 0x17c   : > { %968 = vtanh.f32 %v520_v12 }
 0x17d   : > { %970 = vtanh.f32 %v525_v15 }
 0x17f   : > { %v491_v47 = vpop.f32.mrf.mxu3 }
 0x182   : > { %v969_v55 = vpop.eup %968 }
 0x183   : > { %v522_v16 = vmul.f32 0.5, %v969_v55  ;;  %v971_v14 = vpop.eup %970 }
 0x184   : > { %v527_v19 = vmul.f32 0.5, %v971_v14  ;;  %v620_v14 = vunpack.c.l.bf16 %v867_v29 }
 0x185   : > { %v523_v13 = vadd.f32 0.5, %v522_v16 }
 0x186   : > { %v528_v21 = vadd.f32 0.5, %v527_v19 }
 0x187   : > { %v530_v18 = vmul.f32 %v529_v4, %v523_v13 }
 0x188   : > { %v533_v22 = vsub.f32 1.0, %v528_v21  ;;  %v535_v25 = vmul.f32 %v528_v21, %v471_v1 }
 0x189   : > { %v531_v20 = vadd.f32 %v530_v18, %v478_v9 }
 0x18b   : > { %972 = vtanh.f32 %v531_v20 }
 0x191   : > { %v973_v24 = vpop.eup %972 }
 0x192   : > { %v534_v27 = vmul.f32 %v973_v24, %v533_v22 }
 0x194   : > { %v536_v31 = vadd.f32 %v535_v25, %v534_v27 }
 0x196   : > { %v542_v32 = vsel %vm541_vm1, %v536_v31, %v471_v1 }
 0x197   : > { %v550_v33 = vpack.c.bf16 %v542_v32, %v542_v32 }
 0x199   : > { %559 = vmatmul.bf16.vlgmr.msrb.gmra.mxu2 %v550_v33  ;;  %572 = vmatmul.bf16.vlgmr.msrb.gmra.mxu3 %v550_v33 }
 0x19a   : > { %585 = vmatmul.bf16.vlgmr.msra.gmra.mxu0 %v550_v33 }
 0x217   : > { %v586_v36 = vpop.f32.mrf.mxu0 }
 0x218   : > { %v600_v53 = vadd.f32 %v1418_v39, %v586_v36 }
 0x21c   : > { %v560_v40 = vpop.f32.mrf.mxu2  ;;  %v573_v41 = vpop.f32.mrf.mxu3 }
 0x21d   : > { %v590_v42 = vadd.f32 %v560_v40, %v547_v37  ;;  %v595_v43 = vadd.f32 %v573_v41, %v548_v38 }
 0x21f   : > { %v591_v44 = vmul.f32 0.5, %v590_v42  ;;  %v588_v45 = vpop.f32.mrf.mxu0  ;;  %v596_v46 = vmul.f32 0.5, %v595_v43 }
 0x221   : > { %974 = vtanh.f32 %v591_v44 }
 0x222   : > { %976 = vtanh.f32 %v596_v46 }
 0x224   : > { %v562_v28 = vpop.f32.mrf.mxu2  ;;  %v575_v48 = vpop.f32.mrf.mxu3 }
 0x227   : > { %v975_v49 = vpop.eup %974 }
 0x228   : > { %v593_v51 = vmul.f32 0.5, %v975_v49  ;;  %v977_v52 = vpop.eup %976 }
 0x229   : > { %v598_v58 = vmul.f32 0.5, %v977_v52 }
 0x22a   : > { %v594_v56 = vadd.f32 0.5, %v593_v51 }
 0x22b   : > { %v599_v60 = vadd.f32 0.5, %v598_v58 }
 0x22c   : > { %v601_v57 = vmul.f32 %v600_v53, %v594_v56 }
 0x22d   : > { %v604_v61 = vsub.f32 1.0, %v599_v60  ;;  %v606_v1 = vmul.f32 %v599_v60, %v542_v32 }
 0x22e   : > { %v602_v59 = vadd.f32 %v601_v57, %v549_v54 }
 0x230   : > { %978 = vtanh.f32 %v602_v59 }
 0x236   : > { %v979_v62 = vpop.eup %978 }
 0x237   : > { %v605_v63 = vmul.f32 %v979_v62, %v604_v61 }
 0x239   : > { %v607_v2 = vadd.f32 %v606_v1, %v605_v63 }
 0x23b   : > { %v613_v3 = vsel %vm612_vm2, %v607_v2, %v542_v32 }
 0x23c   : > { %v621_v5 = vpack.c.bf16 %v613_v3, %v613_v3 }
 0x23e   : > { %630 = vmatmul.bf16.vlgmr.msra.gmra.mxu1 %v621_v5  ;;  %643 = vmatmul.bf16.vlgmr.msra.gmra.mxu2 %v621_v5 }
 0x23f   : > { %656 = vmatmul.bf16.vlgmr.msra.gmra.mxu3 %v621_v5 }
 0x2bb   : > { %v631_v8 = vpop.f32.mrf.mxu1 }
 0x2bc   : > { %v661_v10 = vadd.f32 %v631_v8, %v618_v7 }
 0x2be   : > { %v662_v17 = vmul.f32 0.5, %v661_v10 }
 0x2c0   : > { %980 = vtanh.f32 %v662_v17 }
 0x2c1   : > { %v644_v26 = vpop.f32.mrf.mxu2 }
 0x2c2   : > { %v666_v12 = vadd.f32 %v644_v26, %v619_v11  ;;  %v657_v35 = vpop.f32.mrf.mxu3 }
 0x2c3   : > { %v633_v15 = vpop.f32.mrf.mxu1  ;;  %v671_v4 = vadd.f32 %v1418_v39, %v657_v35 }
 0x2c4   : > { %v667_v47 = vmul.f32 0.5, %v666_v12 }
 0x2c6   : > { %v981_v55 = vpop.eup %980  ;;  %982 = vtanh.f32 %v667_v47 }
 0x2c7   : > { %v664_v0 = vmul.f32 0.5, %v981_v55 }
 0x2c9   : > { %v665_v16 = vadd.f32 0.5, %v664_v0  ;;  %v646_v9 = vpop.f32.mrf.mxu2 }
 0x2ca   : > { %v659_v13 = vpop.f32.mrf.mxu3 }
 0x2cb   : > { %v672_v18 = vmul.f32 %v671_v4, %v665_v16 }
 0x2cc   : > { %v983_v19 = vpop.eup %982 }
 0x2cd   : > { %v669_v20 = vmul.f32 0.5, %v983_v19  ;;  %v673_v21 = vadd.f32 %v672_v18, %v620_v14 }
 0x2cf   : > { %984 = vtanh.f32 %v673_v21  ;;  %v670_v22 = vadd.f32 0.5, %v669_v20 }
 0x2d1   : > { %v675_v24 = vsub.f32 1.0, %v670_v22  ;;  %v677_v27 = vmul.f32 %v670_v22, %v613_v3 }
 0x2d5   : > { %v985_v25 = vpop.eup %984 }
 0x2d6   : > { %v676_v31 = vmul.f32 %v985_v25, %v675_v24 }
 0x2d8   : > { %v678_v39 = vadd.f32 %v677_v27, %v676_v31 }
 0x2da   : > { %v684_v32 = vsel %vm683_vm3, %v678_v39, %v613_v3 }
 0x2db   : > { %685 = vst [vmem:[#allocation7] sm:$0xff] %v684_v32 }
 0x2dc   : > { %906 = dma.vmem_to_hbm [thread:$0]  (%p920_p1), %s693_s26, 128, %s695_s9, [#allocation4]  }
 0x2dd   : > { %1099 = dma.done.wait (%p920_p1), [#allocation4], 128  }
 0x2de   : > { %1101 = vsyncadd (%p920_p1), [#allocation4], 4294967168 }
 0x2df PF: > { %p16_p4 = scmp.ge.s32.totalorder %s1193_s27, 4   ;;  %s1479_s15 = smov %s1108_s16 }
 0x2e0   : > { %s1480_s16 = smov %s1112_s17  ;;  %s1481_s17 = smov %s1206_s6 }
 0x2e1   : > { %s1482_s18 = smov %s1193_s27  ;;  %18 = sbr.rel (!%p16_p4) target bundleno = 5 (0x5), region = 84 }
 0x2e6   :  { %708 = vsyncpa [#allocation3], 1 }
 0x2e7   :  { %710 = vsyncpa [#allocation3 + $0x1], 1 }
 0x2e8   :  { %711 = vsyncpa [#allocation6], 1 }
 0x2e9   :  { %712 = vsyncpa [#allocation4], 1 }
 0x2ea   :  { %714 = vsyncpa [#allocation4 + $0x1], 1 }

</bundles_post_ra>
